<compile_context>
chip_gen: v7x
topology: tpu7x:2x2x1
jax: 0.10.0
libtpu: 0.0.40
codegen_flags: <defaults>
</compile_context>

<pallas_src>
import functools
import math

import jax
import jax.numpy as jnp
from jax import lax
from jax.experimental import pallas as pl
from jax.experimental.pallas import tpu as pltpu

NUM_GROUPS = 32
EPS = 1e-5


def _round_up(v, m):
    return (v + m - 1) // m * m


def _group_norm_kernel(x_ref, gamma_ref, beta_ref, seg_ref, o_ref, *,
                       eps, r, n_pblocks):
    """One grid step normalizes r channel rows (= r/Cg whole groups).

    x_ref / o_ref : (r, HW)   channel rows on sublanes, spatial on lanes.
    gamma_ref     : (P, 1)    per-channel weight, whole array resident in VMEM.
    beta_ref      : (P, 1)    per-channel bias.
    seg_ref       : (r, r)    (i, j) = 1/(Cg*HW) if rows i, j share a group, else 0.
    """
    x = x_ref[...].astype(jnp.float32)                         # (r, HW)
    seg = seg_ref[...]                                         # (r, r)

    # Pass 1: per-channel lane sums (XLU), then one tiny MXU matmul that both
    # segment-sums over each group's Cg channels and broadcasts the group mean
    # back to every channel row.
    s1 = jnp.sum(x, axis=1, keepdims=True)                     # (r, 1)
    mean = jnp.dot(seg, s1, preferred_element_type=jnp.float32)  # (r, 1) group mean

    # Pass 2: centered sum of squares -> robust biased variance (block is
    # VMEM-resident; the extra sweep hides under the HBM roofline).
    d = x - mean                                               # (r, HW)
    s2 = jnp.sum(d * d, axis=1, keepdims=True)                 # (r, 1)
    var = jnp.dot(seg, s2, preferred_element_type=jnp.float32)  # (r, 1) >= 0
    inv = lax.rsqrt(var + eps)                                 # (r, 1)

    # Per-channel affine rows for this block (params live whole in VMEM;
    # loaded once for the entire grid).
    if n_pblocks == 1:
        gamma = gamma_ref[...]                                 # (r, 1)
        beta = beta_ref[...]
    else:
        start = (pl.program_id(0) % n_pblocks) * r
        start = pl.multiple_of(start, 8)
        gamma = gamma_ref[pl.ds(start, r), :]
        beta = beta_ref[pl.ds(start, r), :]

    # y = (x - mean) * inv * gamma + beta, as one fused lane-splat FMA sweep.
    scale = gamma * inv                                        # (r, 1)
    o_ref[...] = (d * scale + beta).astype(o_ref.dtype)


def group_norm(x, weight, bias, *, num_groups=NUM_GROUPS, eps=EPS):
    """GroupNorm(32, C) forward. x: (N, C, H, W); weight/bias: (C,)."""
    N, C, H, W = x.shape
    assert C % num_groups == 0, "num_channels must be divisible by num_groups"
    G = num_groups
    Cg = C // G
    HW = H * W
    rows = N * G                          # number of (sample, group) units
    itemsize = jnp.dtype(x.dtype).itemsize

    # dtype-aware sublane tile: 8 (f32), 16 (bf16), 32 (int8/fp8).
    sub_tile = max(8, 32 // itemsize)
    # Minimal groups-per-block so r = rpg*Cg hits the sublane tile (no padding).
    rpg0 = sub_tile // math.gcd(Cg, sub_tile)
    lane_hw = _round_up(HW, 128)

    # Generation-aware VMEM budget (v5e/v6e: 128 MiB, v7x: 64 MiB).
    try:
        vmem_cap = pltpu.get_tpu_info().vmem_capacity_bytes
    except Exception:
        vmem_cap = 64 << 20               # conservative fallback (v7x-sized)
    if vmem_cap >= (100 << 20):
        vmem_cap_limit = 100 << 20        # 128 MiB parts: bigger blocks
    else:
        vmem_cap_limit = 52 << 20         # 64 MiB parts: stay well under
    vmem_budget = int(0.75 * vmem_cap_limit)

    def est_vmem(rpg_):
        r_ = rpg_ * Cg
        return (4 * r_ * lane_hw * itemsize            # x-in + out, double-buffered
                + 4 * r_ * lane_hw * 4                 # f32 working copies (x, d, temps)
                + _round_up(r_, 8) * _round_up(r_, 128) * 4)   # segment matrix

    # Candidate groups-per-block: multiples of rpg0 dividing G, plus whole
    # samples (k*G with k | N) so small feature maps still get large blocks.
    cands = set()
    c = rpg0
    while c <= G:
        if G % c == 0:
            cands.add(c)
        c *= 2
    for k in range(1, N + 1):
        if N % k == 0:
            cands.add(k * G)

    feasible = [c for c in sorted(cands)
                if rows % c == 0
                and rows // c >= 2            # keep >= 2 grid steps (v7x: 2 TCs)
                and c * Cg <= 1024            # cap the (r, r) segment matrix
                and est_vmem(c) <= vmem_budget]
    rpg = max(feasible) if feasible else rpg0
    # TODO(synk): if even rpg0 overflows the VMEM budget (gigantic H*W), add a
    # second grid axis over HW with running sum / centered-sumsq accumulators.

    r = rpg * Cg
    num_blocks = rows // rpg

    # Free reshape: channel rows on sublanes, spatial on lanes.
    x2 = x.reshape(N * C, HW)

    # Tiny per-channel affine params (never pre-broadcast to full size).
    gamma = weight.astype(jnp.float32).reshape(C, 1)
    beta = bias.astype(jnp.float32).reshape(C, 1)
    if r >= C:                                 # a block spans >= 1 whole sample
        reps = r // C
        if reps > 1:
            gamma = jnp.tile(gamma, (reps, 1))
            beta = jnp.tile(beta, (reps, 1))
        n_pblocks = 1
    else:                                      # r | C: params repeat per sample
        n_pblocks = C // r

    # Segment matrix: group-sum + broadcast-back + 1/count, in one MXU matmul.
    gid = jnp.arange(r, dtype=jnp.int32) // Cg
    seg = (gid[:, None] == gid[None, :]).astype(jnp.float32) / float(Cg * HW)

    x_spec = pl.BlockSpec((r, HW), lambda i: (i, 0))
    vmem_full = pl.BlockSpec(memory_space=pltpu.MemorySpace.VMEM)

    vmem_limit = int(min(vmem_cap_limit, max(32 << 20, est_vmem(rpg) + (4 << 20))))

    kernel = functools.partial(_group_norm_kernel, eps=eps, r=r,
                               n_pblocks=n_pblocks)

    cost = pl.CostEstimate(
        flops=8 * N * C * HW,
        transcendentals=rows,
        bytes_accessed=2 * N * C * HW * itemsize + (2 * C + r * r) * 4,
    )

    out2 = pl.pallas_call(
        kernel,
        out_shape=jax.ShapeDtypeStruct((N * C, HW), x.dtype),
        grid_spec=pltpu.PrefetchScalarGridSpec(
            num_scalar_prefetch=0,
            grid=(num_blocks,),
            in_specs=[x_spec, vmem_full, vmem_full, vmem_full],
            out_specs=x_spec,
        ),
        input_output_aliases={0: 0},
        compiler_params=pltpu.CompilerParams(
            dimension_semantics=("parallel",),
            vmem_limit_bytes=vmem_limit,
        ),
        cost_estimate=cost,
    )(x2, gamma, beta, seg)

    return out2.reshape(N, C, H, W)


def _reference_group_norm(x, weight, bias, num_groups=NUM_GROUPS, eps=EPS):
    N, C, H, W = x.shape
    Cg = C // num_groups
    xr = x.reshape(N, num_groups, Cg * H * W).astype(jnp.float32)
    mean = jnp.mean(xr, axis=-1, keepdims=True)
    var = jnp.mean((xr - mean) ** 2, axis=-1, keepdims=True)
    xn = (xr - mean) * jax.lax.rsqrt(var + eps)
    xn = xn.reshape(N, C, H, W)
    return xn * weight.reshape(1, C, 1, 1) + bias.reshape(1, C, 1, 1)


if __name__ == "__main__":
    key = jax.random.PRNGKey(0)
    kx, kw, kb = jax.random.split(key, 3)

    # Config 1: whole-sample blocks (n_pblocks == 1 path).
    N, C, H, W = 2, 64, 16, 16          # C must be a multiple of 32 groups
    x = jax.random.normal(kx, (N, C, H, W), dtype=jnp.float32)
    weight = 1.0 + 0.1 * jax.random.normal(kw, (C,), dtype=jnp.float32)
    bias = 0.1 * jax.random.normal(kb, (C,), dtype=jnp.float32)

    ref = _reference_group_norm(x, weight, bias)
    out = jax.block_until_ready(group_norm(x, weight, bias))
    assert out.shape == (N, C, H, W)
    assert jnp.allclose(out, ref, atol=1e-4, rtol=1e-4), "mismatch vs reference (cfg 1)"

    # Config 2: exercises the in-kernel param slice (n_pblocks > 1), a sub-128
    # lane width, and a non-zero-mean input (stresses the variance path).
    N2, C2, H2, W2 = 1, 128, 8, 8
    x2 = 3.0 + 2.0 * jax.random.normal(kx, (N2, C2, H2, W2), dtype=jnp.float32)
    w2 = 1.0 + 0.1 * jax.random.normal(kw, (C2,), dtype=jnp.float32)
    b2 = 0.1 * jax.random.normal(kb, (C2,), dtype=jnp.float32)

    ref2 = _reference_group_norm(x2, w2, b2)
    out2 = jax.block_until_ready(group_norm(x2, w2, b2))
    assert jnp.allclose(out2, ref2, atol=1e-4, rtol=1e-4), "mismatch vs reference (cfg 2)"

    print("KERNEL_OK")
</pallas_src>

<mosaic_0001>
module attributes {stable_mosaic.version = 11 : i64} {
  func.func @_group_norm_kernel(%arg0: i32, %arg1: memref<64x256xf32, #tpu.memory_space<vmem>>, %arg2: memref<64x1xf32, #tpu.memory_space<vmem>>, %arg3: memref<64x1xf32, #tpu.memory_space<vmem>>, %arg4: memref<64x64xf32, #tpu.memory_space<vmem>>, %arg5: memref<64x256xf32, #tpu.memory_space<vmem>>) attributes {dimension_semantics = [#tpu.dimension_semantics<parallel>], iteration_bounds = array<i64: 2>, scalar_prefetch = 0 : i64, scratch_operands = 0 : i64, tpu.core_type = #tpu.core_type<tc>, window_params = [{transform_indices = @transform_0, window_bounds = array<i64: 64, 256>}, {pipeline_mode = #tpu.pipeline_mode<synchronous>, transform_indices = @transform_1, window_bounds = array<i64: 64, 1>}, {pipeline_mode = #tpu.pipeline_mode<synchronous>, transform_indices = @transform_2, window_bounds = array<i64: 64, 1>}, {pipeline_mode = #tpu.pipeline_mode<synchronous>, transform_indices = @transform_3, window_bounds = array<i64: 64, 64>}, {transform_indices = @transform_4, window_bounds = array<i64: 64, 256>}]} {
    %c0 = arith.constant 0 : index
    %c0_0 = arith.constant 0 : index
    %0 = vector.load %arg1[%c0, %c0_0] : memref<64x256xf32, #tpu.memory_space<vmem>>, vector<64x256xf32>
    %c0_1 = arith.constant 0 : index
    %c0_2 = arith.constant 0 : index
    %1 = vector.load %arg4[%c0_1, %c0_2] : memref<64x64xf32, #tpu.memory_space<vmem>>, vector<64x64xf32>
    %cst = arith.constant dense<0.000000e+00> : vector<64xf32>
    %2 = vector.multi_reduction <add>, %0, %cst [1] : vector<64x256xf32> to vector<64xf32>
    %3 = vector.shape_cast %2 : vector<64xf32> to vector<64x1xf32>
    %cst_3 = arith.constant dense<0.000000e+00> : vector<64x1xf32>
    %4 = tpu.matmul %1, %3, %cst_3 {dimension_numbers = #tpu.dot_dimension_numbers<[1], [0], [0], [1], [0, 0, 1, 1], [], []>} : vector<64x64xf32>, vector<64x1xf32>, vector<64x1xf32> -> vector<64x1xf32>
    %5 = vector.broadcast %4 : vector<64x1xf32> to vector<64x256xf32>
    %6 = arith.subf %0, %5 : vector<64x256xf32>
    %7 = arith.mulf %6, %6 : vector<64x256xf32>
    %cst_4 = arith.constant dense<0.000000e+00> : vector<64xf32>
    %8 = vector.multi_reduction <add>, %7, %cst_4 [1] : vector<64x256xf32> to vector<64xf32>
    %9 = vector.shape_cast %8 : vector<64xf32> to vector<64x1xf32>
    %cst_5 = arith.constant dense<0.000000e+00> : vector<64x1xf32>
    %10 = tpu.matmul %1, %9, %cst_5 {dimension_numbers = #tpu.dot_dimension_numbers<[1], [0], [0], [1], [0, 0, 1, 1], [], []>} : vector<64x64xf32>, vector<64x1xf32>, vector<64x1xf32> -> vector<64x1xf32>
    %cst_6 = arith.constant 9.99999974E-6 : f32
    %11 = vector.broadcast %cst_6 : f32 to vector<64x1xf32>
    %12 = arith.addf %10, %11 : vector<64x1xf32>
    %13 = math.rsqrt %12 : vector<64x1xf32>
    %c0_7 = arith.constant 0 : index
    %c0_8 = arith.constant 0 : index
    %14 = vector.load %arg2[%c0_7, %c0_8] : memref<64x1xf32, #tpu.memory_space<vmem>>, vector<64x1xf32>
    %c0_9 = arith.constant 0 : index
    %c0_10 = arith.constant 0 : index
    %15 = vector.load %arg3[%c0_9, %c0_10] : memref<64x1xf32, #tpu.memory_space<vmem>>, vector<64x1xf32>
    %16 = arith.mulf %14, %13 : vector<64x1xf32>
    %17 = vector.broadcast %16 : vector<64x1xf32> to vector<64x256xf32>
    %18 = arith.mulf %6, %17 : vector<64x256xf32>
    %19 = vector.broadcast %15 : vector<64x1xf32> to vector<64x256xf32>
    %20 = arith.addf %18, %19 : vector<64x256xf32>
    %c0_11 = arith.constant 0 : index
    %c0_12 = arith.constant 0 : index
    %21 = vector.load %arg5[%c0_11, %c0_12] : memref<64x256xf32, #tpu.memory_space<vmem>>, vector<64x256xf32>
    tpu.vector_store %arg5[%c0_11, %c0_12], %20 {strides = array<i32>} : memref<64x256xf32, #tpu.memory_space<vmem>>, vector<64x256xf32>,
    return
  }
  func.func @transform_0(%arg0: i32) -> (i32, i32) {
    %c0_i32 = arith.constant 0 : i32
    %c0_i32_0 = arith.constant 0 : i32
    return %arg0, %c0_i32 : i32, i32
  }
  func.func @transform_1(%arg0: i32) -> (i32, i32) {
    %c0_i32 = arith.constant 0 : i32
    %c0_i32_0 = arith.constant 0 : i32
    %c0_i32_1 = arith.constant 0 : i32
    return %c0_i32, %c0_i32_0 : i32, i32
  }
  func.func @transform_2(%arg0: i32) -> (i32, i32) {
    %c0_i32 = arith.constant 0 : i32
    %c0_i32_0 = arith.constant 0 : i32
    %c0_i32_1 = arith.constant 0 : i32
    return %c0_i32, %c0_i32_0 : i32, i32
  }
  func.func @transform_3(%arg0: i32) -> (i32, i32) {
    %c0_i32 = arith.constant 0 : i32
    %c0_i32_0 = arith.constant 0 : i32
    %c0_i32_1 = arith.constant 0 : i32
    return %c0_i32, %c0_i32_0 : i32, i32
  }
  func.func @transform_4(%arg0: i32) -> (i32, i32) {
    %c0_i32 = arith.constant 0 : i32
    %c0_i32_0 = arith.constant 0 : i32
    return %arg0, %c0_i32 : i32, i32
  }
}

</mosaic_0001>

<bundles_post_ra>
// kernel: tpu_custom_call.1
= control target key start
LH: loop header
LB: loop body
LE: loop exit
PB: predicated region body
PF: predicated region fallthrough
CT: control target
= control target key end

     0   :  { %9 = vsyncpa [#allocation3], 0  ;;  %s1646_s0 = inlined_call_operand.hbm [shape: f32[128,256], index: 0, kind: input, shape index: {}, may-alias: {0,4}]   ;;  %s1647_s1 = inlined_call_operand.vmem [shape: f32[64,1], index: 1, kind: input, shape index: {}]   ;;  %s1648_s2 = inlined_call_operand.vmem [shape: f32[64,1], index: 2, kind: input, shape index: {}]   ;;  %s1649_s3 = inlined_call_operand.vmem [shape: f32[64,64], index: 3, kind: input, shape index: {}]   ;;  %s1650_s4 = inlined_call_operand.hbm [shape: f32[128,256], index: 4, kind: output, shape index: {}, may-alias: {0,4}]  }
   0x1   :  { %11 = vsyncpa [#allocation3 + $0x1], 0 }
   0x2   :  { %12 = vsyncpa [#allocation4], 0 }
   0x3   :  { %14 = vsyncpa [#allocation4 + $0x1], 0  ;;  %s1201_s15 = smov 0   ;;  %s1203_s16 = smov 0  }
   0x4   :  { %s1205_s17 = smov 0   ;;  %s1207_s18 = smov 0  }
   0x5 LB: > { %s1222_s19 = sadd.s32 4294967295, %s1167_s18   ;;  %s846_s20 = sadd.s32 4294967294, %s1167_s18   ;;  %s1167_s18 = sphi %s1207_s18, %s1663_s18   ;;  %s1163_s17 = sphi %s1205_s17, %s1662_s17   ;;  %s1159_s16 = sphi %s1203_s16, %s1661_s16   ;;  %s1155_s15 = sphi %s1201_s15, %s1660_s15  }
   0x6   : > { %s1226_s21 = sadd.s32 1, %s1167_s18   ;;  %s27_s22 = sadd.s32 1, %s1163_s17 }
   0x7   : > { %s24_s23 = ssub.s32 %s1167_s18, %s1226_s21  ;;  %p34_p0 = scmp.ne.s32.totalorder %s1163_s17, %s1159_s16 }
   0x8   : > { %p25_p1 = scmp.eq.s32.totalorder %s24_s23, 0  ;;  %p35_p2 = scmp.eq.s32.totalorder %s1167_s18, 0 }
   0x9   : > { %p40_p3 = scmp.ne.s32.totalorder %s1159_s16, %s1155_s15  ;;  %p41_p4 = scmp.eq.s32.totalorder %s1222_s19, 0 }
   0xa   : > { %s1238_s24 = scalar_select %p25_p1, %s1163_s17, %s27_s22  }
   0xb   : > { %p1240_p5 = por %p35_p2, %p34_p0  ;;  %p1244_p6 = por %p41_p4, %p40_p3 }
   0xc   : > { %p127_p7 = scmp.eq.s32.totalorder %s1222_s19, 1  ;;  %p133_p8 = scmp.eq.s32.totalorder %s846_s20, 1 }
   0xd   : > { %p1014_p10 = scmp.lt.s32.totalorder %s1167_s18, 2  ;;  %s162_s29 = sand.u32 1, %s1163_s17  }
   0xe   : > { %p1251_p11 = por %p127_p7, %p34_p0  ;;  %p1255_p12 = por %p133_p8, %p40_p3 }
   0xf   : > { %s879_s30 = sshll.u32 %s1167_s18, 11  ;;  %s849_s5 = sshll.u32 %s162_s29, 7 }
  0x10   : > { %s1654_s27 = scalar_select %p1251_p11, 1, 0 }
  0x11   : > { %s1655_s28 = scalar_select %p1255_p12, 1, 0 }
  0x12   : > { %s1264_s8 = scalar_lea.hbm %s1646_s0, %s879_s30  ;;  %s166_s9 = scalar_lea.vmem [#allocation2], %s849_s5 }
  0x13   : > { %s174_s10 = sshll.u32 %s166_s9, 4  ;;  %p1268_p13 = pnand %p1014_p10, %p1240_p5  ;;  %s1272_s10 = int_to_ptr.vmem [resolvable:$true] %s174_s10 }
  0x14   : > { %s1274_s12 = scalar_lea.sflag [#allocation3], %s162_s29  ;;  %s1071_s13 = scalar_lea.hbm %s1264_s8, 2048 }
  0x15   : > { %p1072_p0 = scmp.ne.s32.totalorder %s1264_s8, %s1071_s13  ;;  %p1073_p1 = pneg %p1268_p13 }
  0x16   : > { %s1076_s22 = scalar_lea.hbm %s1646_s0, 4096  ;;  %p1077_p4 = scmp.lt.u32.totalorder %s1264_s8, %s1646_s0 }
  0x17   : > { %p1074_p2 = pnand %p1073_p1, %p1072_p0  ;;  %p1078_p5 = scmp.lt.u32.totalorder %s1076_s22, %s1071_s13 }
  0x18   : > { %p1080_p8 = scmp.lt.u32.totalorder %s1071_s13, %s1264_s8 }
  0x19   : > { %p1075_p3 = pneg %p1074_p2  ;;  %p1079_p7 = por %p1078_p5, %p1077_p4 }
  0x1b   : > { %p1081_p10 = por %p1080_p8, %p1079_p7 }
  0x1d   : > { %p1082_p9 = pnand %p1081_p10, %p1075_p3 }
  0x1f   : > { %1085 = shalt.err (!%p1082_p9)
}
  0x20   : > { %s1086_s29 = scalar_lea.vmem %s1272_s10, 2048  ;;  %s1169_s30 = smov [#allocation2]  }
  0x21   : > { %p1087_p0 = scmp.ne.s32.totalorder %s1272_s10, %s1086_s29  ;;  %s1091_s5 = sshll.u32 %s1169_s30, 4  ;;  %s1092_s5 = int_to_ptr.vmem [resolvable:$false] %s1091_s5 }
  0x22   : > { %s1093_s6 = scalar_lea.vmem %s1092_s5, 4096  ;;  %p1094_p11 = scmp.lt.s32.totalorder %s1272_s10, %s1092_s5 }
  0x23   : > { %p1089_p2 = pnand %p1087_p0, %p1073_p1  ;;  %p1095_p4 = scmp.lt.s32.totalorder %s1093_s6, %s1086_s29 }
  0x25   : > { %p1090_p12 = pneg %p1089_p2  ;;  %p1096_p5 = por %p1095_p4, %p1094_p11 }
  0x27   : > { %p1097_p7 = pnand %p1096_p5, %p1090_p12 }
  0x29   : > { %1100 = shalt.err (!%p1097_p7)
}
  0x2a   : > { %s1170_s7 = smov 256   ;;  %s1171_s9 = smov 16  }
  0x2b   : > { %1009 = dma.hbm_to_vmem [thread:$0]  (!%p1268_p13), %s1264_s8, 2048, %s1272_s10, %s1274_s12, %s1170_s7, %s1170_s7, %s1171_s9  }
  0x2c   : > { %p853_p9 = scmp.ge.s32.totalorder %s1167_s18, 1  ;;  %p182_p1 = scmp.lt.s32.totalorder %s1167_s18, 3 }
  0x2e   : > { %p183_p3 = pnand %p853_p9, %p182_p1 }
  0x2f   : > { %s1305_s13 = sand.u32 (!%p183_p3), 1, %s1159_s16  }
  0x30   : > { %186 = sbr.rel (%p183_p3) target bundleno = 1132 (0x46c), region = 36  ;;  %s854_s14 = sshll.u32 (!%p183_p3), %s1305_s13, 7 }
  0x31   : > { %s189_s20 = scalar_lea.sflag (!%p183_p3), [#allocation3], %s1305_s13  ;;  %s192_s22 = scalar_lea.vmem (!%p183_p3), [#allocation2], %s854_s14 }
  0x37   : > { %1146 = dma.done.wait (%p1244_p6), %s189_s20, 2048  }
  0x38   : > { %1148 = vsyncadd (%p1244_p6), %s189_s20, 4294965248  ;;  %v1315_v0 = vld [vmem:[%s192_s22 + $0x20] sm:$0xff]  ;;  %v1317_v1 = vld [vmem:[%s192_s22 + $0x28] sm:$0xff]  ;;  %vm267_vm0 = vcmask 523264   ;;  %v1172_v25 = vmov 0   ;;  %s1565_s11 = scalar_lea.vmem [#allocation5], %s854_s14 }
  0x39   : > { %v1319_v2 = vld [vmem:[%s192_s22] sm:$0xff]  ;;  %v249_v3 = vadd.f32 %v1317_v1, %v1315_v0  ;;  %v1323_v4 = vld [vmem:[%s192_s22 + $0x8] sm:$0xff]  ;;  %v1325_v5 = vld [vmem:[%s192_s22 + $0x30] sm:$0xff]  ;;  %1054 = vset.pattern.permute.xlu1 %v1172_v25  ;;  %1053 = vset.pattern.permute.xlu0 %v1172_v25  ;;  %s881_s14 = sshll.u32 %s1222_s19, 11  ;;  %s773_s12 = sshll.u32 %s1565_s11, 4  ;;  %s1598_s12 = int_to_ptr.vmem [resolvable:$true] %s773_s12 }
  0x3a   : > { %v1327_v6 = vld [vmem:[%s192_s22 + $0x38] sm:$0xff]  ;;  %v243_v7 = vadd.f32 %v1323_v4, %v1319_v2  ;;  %v1331_v8 = vld [vmem:[%s192_s22 + $0x10] sm:$0xff]  ;;  %v1343_v14 = vld [vmem:[%s192_s22 + $0x40] sm:$0xff]  ;;  %s1596_s29 = scalar_lea.hbm %s1650_s4, %s881_s14  ;;  %s759_s19 = scalar_lea.sflag [#allocation4], %s1305_s13 }
  0x3b   : > { %v1333_v9 = vld [vmem:[%s192_s22 + $0x18] sm:$0xff]  ;;  %250 = vadd.xlane.f32.xlu1 %v249_v3  ;;  %v252_v10 = vadd.f32 %v1327_v6, %v1325_v5  ;;  %v1339_v12 = vld [vmem:[%s192_s22 + $0x50] sm:$0xff]  ;;  %v1345_v15 = vld [vmem:[%s192_s22 + $0x48] sm:$0xff]  ;;  %s1101_s30 = scalar_lea.vmem %s1598_s12, 2048  ;;  %p1657_p11 = scmp.ne.s32.totalorder %s1654_s27, 0 }
  0x3c   : > { %244 = vadd.xlane.f32.xlu0 %v243_v7  ;;  %v246_v11 = vadd.f32 %v1333_v9, %v1331_v8  ;;  %v1341_v13 = vld [vmem:[%s192_s22 + $0x58] sm:$0xff]  ;;  %v255_v17 = vadd.f32 %v1345_v15, %v1343_v14  ;;  %v1351_v18 = vld [vmem:[%s192_s22 + $0x70] sm:$0xff]  ;;  %v1355_v20 = vld [vmem:[%s192_s22 + $0x60] sm:$0xff]  ;;  %p1102_p6 = scmp.ne.s32.totalorder %s1598_s12, %s1101_s30  ;;  %s1173_s5 = smov [#allocation5]  }
  0x3d   : > { %v258_v16 = vadd.f32 %v1341_v13, %v1339_v12  ;;  %v1353_v19 = vld [vmem:[%s192_s22 + $0x78] sm:$0xff]  ;;  %v1357_v21 = vld [vmem:[%s192_s22 + $0x68] sm:$0xff]  ;;  %v235_v24 = vld [vmem:[%s1649_s3] sm:$0xff]  ;;  %s1105_s6 = sshll.u32 %s1173_s5, 4  ;;  %s1106_s6 = int_to_ptr.vmem [resolvable:$false] %s1105_s6 }
  0x3e   : > { %v264_v22 = vadd.f32 %v1353_v19, %v1351_v18  ;;  %v261_v23 = vadd.f32 %v1357_v21, %v1355_v20  ;;  %930 = vmatprep.mubr.msk.f32.mxu0 %vm267_vm0, %v235_v24  ;;  %958 = vmatprep.mubr.msk.f32.mxu1 %vm267_vm0, %v235_v24  ;;  %v1371_v38 = vld [vmem:[%s1649_s3 + $0x8] sm:$0xff]  ;;  %v1376_v39 = vld [vmem:[%s1649_s3 + $0x10] sm:$0xff]  ;;  %v1385_v40 = vld [vmem:[%s1649_s3 + $0x18] sm:$0xff]  ;;  %p1103_p12 = pnand %p1102_p6, %p1657_p11  ;;  %s1107_s7 = scalar_lea.vmem %s1106_s6, 4096 }
  0x3f   : > { %253 = vadd.xlane.f32.xlu1 %v252_v10  ;;  %v1390_v41 = vld [vmem:[%s1649_s3 + $0x20] sm:$0xff]  ;;  %v1399_v42 = vld [vmem:[%s1649_s3 + $0x28] sm:$0xff]  ;;  %v1404_v43 = vld [vmem:[%s1649_s3 + $0x30] sm:$0xff]  ;;  %p1108_p8 = scmp.lt.s32.totalorder %s1598_s12, %s1106_s6  ;;  %p1109_p10 = scmp.lt.s32.totalorder %s1107_s7, %s1101_s30 }
  0x40   : > { %247 = vadd.xlane.f32.xlu0 %v246_v11  ;;  %v1413_v44 = vld [vmem:[%s1649_s3 + $0x38] sm:$0xff]  ;;  %p1104_p13 = pneg %p1103_p12 }
  0x41   : > { %p1110_p0 = por %p1109_p10, %p1108_p8 }
  0x43   : > { %259 = vadd.xlane.f32.xlu1 %v258_v16  ;;  %p1111_p2 = pnand %p1110_p0, %p1104_p13 }
  0x44   : > { %256 = vadd.xlane.f32.xlu0 %v255_v17 }
  0x47   : > { %265 = vadd.xlane.f32.xlu1 %v264_v22 }
  0x48   : > { %262 = vadd.xlane.f32.xlu0 %v261_v23 }
  0xc8   : > { %v251_v26 = vpop.xlane.xlu1 %250 }
  0xc9   : > { %v245_v27 = vpop.xlane.xlu0 %244 }
  0xcc   : > { %v254_v28 = vpop.xlane.xlu1 %253 }
  0xcd   : > { %v248_v29 = vpop.xlane.xlu0 %247  ;;  %v974_v31 = vpack.c.bf16 %v254_v28, %v251_v26 }
  0xce   : > { %v970_v30 = vpack.c.bf16 %v248_v29, %v245_v27 }
  0xd0   : > { %971 = vmatprep.subr.bf16.mxu0 %v970_v30  ;;  %v260_v32 = vpop.xlane.xlu1 %259 }
  0xd1   : > { %973 = vmatpush3.bf16.msra.mxu0 %v970_v30  ;;  %v257_v33 = vpop.xlane.xlu0 %256 }
  0xd2   : > { %975 = vmatprep.subr.bf16.mxu0 %v974_v31  ;;  %v978_v34 = vpack.c.bf16 %v260_v32, %v257_v33 }
  0xd4   : > { %v266_v35 = vpop.xlane.xlu1 %265 }
  0xd5   : > { %977 = vmatpush3.bf16.msra.mxu0 %v974_v31  ;;  %v263_v36 = vpop.xlane.xlu0 %262 }
  0xd6   : > { %979 = vmatprep.subr.bf16.mxu0 %v978_v34  ;;  %v982_v37 = vpack.c.bf16 %v266_v35, %v263_v36 }
  0xd9   : > { %981 = vmatpush3.bf16.msra.mxu0 %v978_v34 }
  0xda   : > { %983 = vmatprep.subr.bf16.mxu0 %v982_v37 }
  0xdd   : > { %985 = vmatpush3.bf16.msra.mxu0 %v982_v37 }
  0xe0   : > { %931 = vmatmul.mubr.msk.f32.vlgmr.msra.gmra.mrb[0].mxu0 %vm267_vm0, %v1371_v38 }
  0xe1   : > { %933 = vmatprep.mubr.msk.f32.mxu0 %vm267_vm0, %v1376_v39 }
  0xe4   : > { %934 = vmatmul.mubr.msk.f32.gmra.mrb[2].mxu0 %vm267_vm0, %v1385_v40 }
  0xe5   : > { %936 = vmatprep.mubr.msk.f32.mxu0 %vm267_vm0, %v1390_v41 }
  0xe8   : > { %937 = vmatmul.mubr.msk.f32.gmra.mrb[4].mxu0 %vm267_vm0, %v1399_v42 }
  0xe9   : > { %939 = vmatprep.mubr.msk.f32.mxu0 %vm267_vm0, %v1404_v43 }
  0xec   : > { %940 = vmatmul.mubr.msk.f32.gmra.mrb[6].mxu0 %vm267_vm0, %v1413_v44 }
 0x1b3   : > { %v932_v45 = vpop.f32.mrb[0].mxu0 }
 0x1b4   : > { %404 = vperm.xlu1 %1054, %v932_v45   ;;  %v358_v46 = vpop.f32.mrb[1].mxu0 }
 0x1b5   : > { %399 = vperm.xlu0 %1053, %v358_v46   ;;  %v614_v46 = vld [vmem:[%s1648_s2] sm:$0xff] }
 0x1b7   : > { %v935_v47 = vpop.f32.mrb[2].mxu0 }
 0x1b8   : > { %414 = vperm.xlu1 %1054, %v935_v47   ;;  %v368_v48 = vpop.f32.mrb[3].mxu0  ;;  %v617_v47 = vld [vmem:[%s1648_s2 + $0x18] sm:$0xff] }
 0x1bb   : > { %v938_v49 = vpop.f32.mrb[4].mxu0 }
 0x1bc   : > { %409 = vperm.xlu1 %1054, %v368_v48   ;;  %v378_v50 = vpop.f32.mrb[5].mxu0  ;;  %v618_v48 = vld [vmem:[%s1648_s2 + $0x20] sm:$0xff] }
 0x1bf   : > { %v941_v51 = vpop.f32.mrb[6].mxu0 }
 0x1c0   : > { %424 = vperm.xlu1 %1054, %v938_v49   ;;  %v388_v52 = vpop.f32.mrb[7].mxu0  ;;  %v619_v49 = vld [vmem:[%s1648_s2 + $0x28] sm:$0xff] }
 0x1c4   : > { %419 = vperm.xlu1 %1054, %v378_v50  }
 0x1c8   : > { %429 = vperm.xlu1 %1054, %v388_v52  }
 0x1cc   : > { %434 = vperm.xlu1 %1054, %v941_v51  }
 0x233   : > { %v405_v53 = vpop.permute.xlu1 %404 }
 0x234   : > { %v1418_v54 = vsub.f32 %v1331_v8, %v405_v53  ;;  %v1421_v55 = vsub.f32 %v1333_v9, %v405_v53  ;;  %v400_v56 = vpop.permute.xlu0 %399 }
 0x235   : > { %v1424_v57 = vsub.f32 %v1319_v2, %v400_v56  ;;  %v1427_v58 = vsub.f32 %v1323_v4, %v400_v56 }
 0x236   : > { %v455_v59 = vmul.f32 %v1418_v54, %v1418_v54  ;;  %v456_v60 = vmul.f32 %v1421_v55, %v1421_v55 }
 0x237   : > { %v415_v61 = vpop.permute.xlu1 %414  ;;  %v453_v62 = vmul.f32 %v1424_v57, %v1424_v57  ;;  %v454_v63 = vmul.f32 %v1427_v58, %v1427_v58 }
 0x238   : > { %v1438_v3 = vsub.f32 %v1325_v5, %v415_v61  ;;  %v1441_v2 = vsub.f32 %v1327_v6, %v415_v61  ;;  %v472_v4 = vadd.f32 %v456_v60, %v455_v59 }
 0x239   : > { %v469_v7 = vadd.f32 %v454_v63, %v453_v62 }
 0x23a   : > { %473 = vadd.xlane.f32.xlu0 %v472_v4  ;;  %v459_v8 = vmul.f32 %v1438_v3, %v1438_v3  ;;  %v460_v9 = vmul.f32 %v1441_v2, %v1441_v2 }
 0x23b   : > { %v410_v10 = vpop.permute.xlu1 %409  ;;  %470 = vadd.xlane.f32.xlu1 %v469_v7 }
 0x23c   : > { %v1448_v11 = vsub.f32 %v1315_v0, %v410_v10  ;;  %v1451_v5 = vsub.f32 %v1317_v1, %v410_v10  ;;  %v478_v16 = vadd.f32 %v460_v9, %v459_v8 }
 0x23e   : > { %v457_v6 = vmul.f32 %v1448_v11, %v1448_v11  ;;  %v458_v17 = vmul.f32 %v1451_v5, %v1451_v5 }
 0x23f   : > { %v425_v22 = vpop.permute.xlu1 %424  ;;  %479 = vadd.xlane.f32.xlu1 %v478_v16 }
 0x240   : > { %v1458_v23 = vsub.f32 %v1339_v12, %v425_v22  ;;  %v1461_v24 = vsub.f32 %v1341_v13, %v425_v22  ;;  %v475_v0 = vadd.f32 %v458_v17, %v457_v6 }
 0x242   : > { %476 = vadd.xlane.f32.xlu0 %v475_v0  ;;  %v463_v1 = vmul.f32 %v1458_v23, %v1458_v23  ;;  %v464_v25 = vmul.f32 %v1461_v24, %v1461_v24  ;;  %v606_v0 = vld [vmem:[%s1647_s1] sm:$0xff] }
 0x243   : > { %v420_v26 = vpop.permute.xlu1 %419 }
 0x244   : > { %v1468_v27 = vsub.f32 %v1343_v14, %v420_v26  ;;  %v1471_v28 = vsub.f32 %v1345_v15, %v420_v26  ;;  %v484_v12 = vadd.f32 %v464_v25, %v463_v1 }
 0x246   : > { %485 = vadd.xlane.f32.xlu1 %v484_v12  ;;  %v461_v13 = vmul.f32 %v1468_v27, %v1468_v27  ;;  %v462_v29 = vmul.f32 %v1471_v28, %v1471_v28 }
 0x247   : > { %v430_v30 = vpop.permute.xlu1 %429 }
 0x248   : > { %v1478_v31 = vsub.f32 %v1355_v20, %v430_v30  ;;  %v1481_v32 = vsub.f32 %v1357_v21, %v430_v30  ;;  %v481_v14 = vadd.f32 %v462_v29, %v461_v13 }
 0x24a   : > { %482 = vadd.xlane.f32.xlu0 %v481_v14  ;;  %v465_v15 = vmul.f32 %v1478_v31, %v1478_v31  ;;  %v466_v33 = vmul.f32 %v1481_v32, %v1481_v32  ;;  %v609_v14 = vld [vmem:[%s1647_s1 + $0x18] sm:$0xff] }
 0x24b   : > { %v435_v34 = vpop.permute.xlu1 %434 }
 0x24c   : > { %v1488_v35 = vsub.f32 %v1351_v18, %v435_v34  ;;  %v1491_v36 = vsub.f32 %v1353_v19, %v435_v34  ;;  %v487_v20 = vadd.f32 %v466_v33, %v465_v15  ;;  %v615_v18 = vld [vmem:[%s1648_s2 + $0x8] sm:$0xff]  ;;  %v616_v19 = vld [vmem:[%s1648_s2 + $0x10] sm:$0xff] }
 0x24d   : > { %v608_v15 = vld [vmem:[%s1647_s1 + $0x10] sm:$0xff] }
 0x24e   : > { %488 = vadd.xlane.f32.xlu0 %v487_v20  ;;  %v467_v21 = vmul.f32 %v1488_v35, %v1488_v35  ;;  %v468_v37 = vmul.f32 %v1491_v36, %v1491_v36 }
 0x250   : > { %v490_v45 = vadd.f32 %v468_v37, %v467_v21  ;;  %v611_v37 = vld [vmem:[%s1647_s1 + $0x28] sm:$0xff] }
 0x252   : > { %491 = vadd.xlane.f32.xlu1 %v490_v45  ;;  %v610_v45 = vld [vmem:[%s1647_s1 + $0x20] sm:$0xff] }
 0x263   : > { %688 = vperm.xlu1 %1054, %v614_v46  }
 0x264   : > { %693 = vperm.xlu0 %1053, %v615_v18  }
 0x267   : > { %698 = vperm.xlu1 %1054, %v616_v19  }
 0x268   : > { %703 = vperm.xlu0 %1053, %v617_v47  }
 0x26b   : > { %708 = vperm.xlu1 %1054, %v618_v48   ;;  %v613_v48 = vld [vmem:[%s1647_s1 + $0x38] sm:$0xff] }
 0x26c   : > { %713 = vperm.xlu0 %1053, %v619_v49   ;;  %v612_v49 = vld [vmem:[%s1647_s1 + $0x30] sm:$0xff] }
 0x2c7   : > { %v474_v50 = vpop.xlane.xlu0 %473 }
 0x2c8   : > { %v471_v51 = vpop.xlane.xlu1 %470 }
 0x2c9   : > { %v986_v52 = vpack.c.bf16 %v474_v50, %v471_v51 }
 0x2cb   : > { %987 = vmatprep.subr.bf16.mxu1 %v986_v52 }
 0x2cc   : > { %989 = vmatpush3.bf16.msra.mxu1 %v986_v52  ;;  %v480_v53 = vpop.xlane.xlu1 %479 }
 0x2cf   : > { %v477_v56 = vpop.xlane.xlu0 %476 }
 0x2d0   : > { %v990_v59 = vpack.c.bf16 %v480_v53, %v477_v56  ;;  %v620_v56 = vld [vmem:[%s1648_s2 + $0x30] sm:$0xff] }
 0x2d2   : > { %991 = vmatprep.subr.bf16.mxu1 %v990_v59 }
 0x2d3   : > { %993 = vmatpush3.bf16.msra.mxu1 %v990_v59  ;;  %v486_v60 = vpop.xlane.xlu1 %485  ;;  %v621_v59 = vld [vmem:[%s1648_s2 + $0x38] sm:$0xff] }
 0x2d7   : > { %v483_v61 = vpop.xlane.xlu0 %482 }
 0x2d8   : > { %v994_v62 = vpack.c.bf16 %v486_v60, %v483_v61 }
 0x2da   : > { %995 = vmatprep.subr.bf16.mxu1 %v994_v62 }
 0x2db   : > { %997 = vmatpush3.bf16.msra.mxu1 %v994_v62  ;;  %v489_v63 = vpop.xlane.xlu0 %488 }
 0x2df   : > { %v492_v4 = vpop.xlane.xlu1 %491 }
 0x2e0   : > { %v998_v7 = vpack.c.bf16 %v492_v4, %v489_v63 }
 0x2e2   : > { %999 = vmatprep.subr.bf16.mxu1 %v998_v7 }
 0x2e3   : > { %1001 = vmatpush3.bf16.msra.mxu1 %v998_v7  ;;  %v689_v60 = vpop.permute.xlu1 %688  ;;  %v694_v61 = vpop.permute.xlu0 %693 }
 0x2e6   : > { %959 = vmatmul.mubr.msk.f32.vlgmr.msra.gmra.mrb[0].mxu1 %vm267_vm0, %v1371_v38 }
 0x2e7   : > { %961 = vmatprep.mubr.msk.f32.mxu1 %vm267_vm0, %v1376_v39  ;;  %v699_v62 = vpop.permute.xlu1 %698  ;;  %v704_v63 = vpop.permute.xlu0 %703 }
 0x2ea   : > { %962 = vmatmul.mubr.msk.f32.gmra.mrb[2].mxu1 %vm267_vm0, %v1385_v40 }
 0x2eb   : > { %964 = vmatprep.mubr.msk.f32.mxu1 %vm267_vm0, %v1390_v41  ;;  %v709_v4 = vpop.permute.xlu1 %708  ;;  %v714_v7 = vpop.permute.xlu0 %713 }
 0x2ee   : > { %965 = vmatmul.mubr.msk.f32.gmra.mrb[4].mxu1 %vm267_vm0, %v1399_v42 }
 0x2ef   : > { %967 = vmatprep.mubr.msk.f32.mxu1 %vm267_vm0, %v1404_v43  ;;  %v607_v43 = vld [vmem:[%s1647_s1 + $0x8] sm:$0xff] }
 0x2f2   : > { %968 = vmatmul.mubr.msk.f32.gmra.mrb[6].mxu1 %vm267_vm0, %v1413_v44 }
 0x3b9   : > { %v960_v8 = vpop.f32.mrb[0].mxu1 }
 0x3ba   : > { %v565_v38 = vadd.f32 1e-05, %v960_v8  ;;  %v559_v9 = vpop.f32.mrb[1].mxu1 }
 0x3bb   : > { %v560_v10 = vadd.f32 1e-05, %v559_v9 }
 0x3bc   : > { %1055 = vrsqrt.f32 %v565_v38 }
 0x3bd   : > { %1057 = vrsqrt.f32 %v560_v10  ;;  %v963_v39 = vpop.f32.mrb[2].mxu1 }
 0x3be   : > { %v575_v40 = vadd.f32 1e-05, %v963_v39  ;;  %v569_v16 = vpop.f32.mrb[3].mxu1 }
 0x3bf   : > { %v570_v6 = vadd.f32 1e-05, %v569_v16 }
 0x3c0   : > { %1059 = vrsqrt.f32 %v575_v40 }
 0x3c1   : > { %1061 = vrsqrt.f32 %v570_v6  ;;  %v966_v41 = vpop.f32.mrb[4].mxu1 }
 0x3c2   : > { %v585_v42 = vadd.f32 1e-05, %v966_v41  ;;  %v579_v17 = vpop.f32.mrb[5].mxu1 }
 0x3c3   : > { %v580_v22 = vadd.f32 1e-05, %v579_v17 }
 0x3c4   : > { %1063 = vrsqrt.f32 %v585_v42 }
 0x3c5   : > { %1065 = vrsqrt.f32 %v580_v22  ;;  %v969_v44 = vpop.f32.mrb[6].mxu1 }
 0x3c6   : > { %v1056_v1 = vpop.eup %1055  ;;  %v595_v25 = vadd.f32 1e-05, %v969_v44  ;;  %v589_v26 = vpop.f32.mrb[7].mxu1 }
 0x3c7   : > { %v1058_v12 = vpop.eup %1057  ;;  %v590_v13 = vadd.f32 1e-05, %v589_v26  ;;  %v623_v29 = vmul.f32 %v1056_v1, %v607_v43 }
 0x3c8   : > { %1067 = vrsqrt.f32 %v595_v25  ;;  %v622_v30 = vmul.f32 %v1058_v12, %v606_v0 }
 0x3c9   : > { %1069 = vrsqrt.f32 %v590_v13  ;;  %637 = vperm.xlu1 %1054, %v623_v29  }
 0x3ca   : > { %v1060_v33 = vpop.eup %1059  ;;  %632 = vperm.xlu0 %1053, %v622_v30  }
 0x3cb   : > { %v1062_v34 = vpop.eup %1061  ;;  %v625_v20 = vmul.f32 %v1060_v33, %v609_v14 }
 0x3cc   : > { %v624_v21 = vmul.f32 %v1062_v34, %v608_v15 }
 0x3ce   : > { %v1064_v46 = vpop.eup %1063  ;;  %642 = vperm.xlu1 %1054, %v624_v21   ;;  %647 = vperm.xlu0 %1053, %v625_v20  }
 0x3cf   : > { %v1066_v18 = vpop.eup %1065  ;;  %v627_v19 = vmul.f32 %v1064_v46, %v611_v37 }
 0x3d0   : > { %v626_v47 = vmul.f32 %v1066_v18, %v610_v45 }
 0x3d2   : > { %v1068_v50 = vpop.eup %1067  ;;  %652 = vperm.xlu1 %1054, %v626_v47   ;;  %657 = vperm.xlu0 %1053, %v627_v19  }
 0x3d3   : > { %v1070_v51 = vpop.eup %1069  ;;  %v629_v52 = vmul.f32 %v1068_v50, %v613_v48 }
 0x3d4   : > { %v628_v53 = vmul.f32 %v1070_v51, %v612_v49 }
 0x3d6   : > { %662 = vperm.xlu1 %1054, %v628_v53   ;;  %667 = vperm.xlu0 %1053, %v629_v52  }
 0x3da   : > { %718 = vperm.xlu1 %1054, %v620_v56   ;;  %723 = vperm.xlu0 %1053, %v621_v59  }
 0x448   : > { %v638_v8 = vpop.permute.xlu1 %637 }
 0x449   : > { %v672_v38 = vmul.f32 %v638_v8, %v1418_v54  ;;  %v673_v9 = vmul.f32 %v638_v8, %v1421_v55  ;;  %v633_v10 = vpop.permute.xlu0 %632 }
 0x44a   : > { %v670_v39 = vmul.f32 %v633_v10, %v1424_v57  ;;  %v671_v40 = vmul.f32 %v633_v10, %v1427_v58 }
 0x44b   : > { %v728_v16 = vadd.f32 %v694_v61, %v672_v38  ;;  %v729_v6 = vadd.f32 %v694_v61, %v673_v9 }
 0x44c   : > { %v726_v41 = vadd.f32 %v689_v60, %v670_v39  ;;  %v727_v42 = vadd.f32 %v689_v60, %v671_v40 }
 0x44d   : > { %744 = vst [vmem:[%s1565_s11 + $0x10] sm:$0xff] %v728_v16  ;;  %745 = vst [vmem:[%s1565_s11 + $0x18] sm:$0xff] %v729_v6  ;;  %v648_v54 = vpop.permute.xlu0 %647  ;;  %v643_v55 = vpop.permute.xlu1 %642 }
 0x44e   : > { %742 = vst [vmem:[%s1565_s11] sm:$0xff] %v726_v41  ;;  %743 = vst [vmem:[%s1565_s11 + $0x8] sm:$0xff] %v727_v42  ;;  %v676_v57 = vmul.f32 %v648_v54, %v1438_v3  ;;  %v677_v58 = vmul.f32 %v648_v54, %v1441_v2  ;;  %v674_v17 = vmul.f32 %v643_v55, %v1448_v11 }
 0x44f   : > { %v675_v22 = vmul.f32 %v643_v55, %v1451_v5 }
 0x450   : > { %v732_v43 = vadd.f32 %v704_v63, %v676_v57  ;;  %v733_v44 = vadd.f32 %v704_v63, %v677_v58  ;;  %v730_v0 = vadd.f32 %v699_v62, %v674_v17 }
 0x451   : > { %v731_v1 = vadd.f32 %v699_v62, %v675_v22  ;;  %v658_v25 = vpop.permute.xlu0 %657  ;;  %v653_v26 = vpop.permute.xlu1 %652 }
 0x452   : > { %748 = vst [vmem:[%s1565_s11 + $0x30] sm:$0xff] %v732_v43  ;;  %749 = vst [vmem:[%s1565_s11 + $0x38] sm:$0xff] %v733_v44  ;;  %v680_v3 = vmul.f32 %v658_v25, %v1458_v23  ;;  %v681_v2 = vmul.f32 %v658_v25, %v1461_v24  ;;  %v678_v11 = vmul.f32 %v653_v26, %v1468_v27 }
 0x453   : > { %746 = vst [vmem:[%s1565_s11 + $0x20] sm:$0xff] %v730_v0  ;;  %747 = vst [vmem:[%s1565_s11 + $0x28] sm:$0xff] %v731_v1  ;;  %v679_v5 = vmul.f32 %v653_v26, %v1471_v28 }
 0x454   : > { %v736_v12 = vadd.f32 %v714_v7, %v680_v3  ;;  %v737_v13 = vadd.f32 %v714_v7, %v681_v2  ;;  %v734_v29 = vadd.f32 %v709_v4, %v678_v11 }
 0x455   : > { %v735_v30 = vadd.f32 %v709_v4, %v679_v5  ;;  %v668_v14 = vpop.permute.xlu0 %667  ;;  %v663_v15 = vpop.permute.xlu1 %662 }
 0x456   : > { %752 = vst [vmem:[%s1565_s11 + $0x50] sm:$0xff] %v736_v12  ;;  %753 = vst [vmem:[%s1565_s11 + $0x58] sm:$0xff] %v737_v13  ;;  %v684_v23 = vmul.f32 %v668_v14, %v1488_v35  ;;  %v685_v24 = vmul.f32 %v668_v14, %v1491_v36  ;;  %v682_v27 = vmul.f32 %v663_v15, %v1478_v31 }
 0x457   : > { %750 = vst [vmem:[%s1565_s11 + $0x40] sm:$0xff] %v734_v29  ;;  %751 = vst [vmem:[%s1565_s11 + $0x48] sm:$0xff] %v735_v30  ;;  %v683_v28 = vmul.f32 %v663_v15, %v1481_v32 }
 0x459   : > { %v724_v33 = vpop.permute.xlu0 %723  ;;  %v719_v34 = vpop.permute.xlu1 %718 }
 0x45a   : > { %v740_v35 = vadd.f32 %v724_v33, %v684_v23  ;;  %v741_v20 = vadd.f32 %v724_v33, %v685_v24  ;;  %v738_v36 = vadd.f32 %v719_v34, %v682_v27  ;;  %v739_v21 = vadd.f32 %v719_v34, %v683_v28 }
 0x45c   : > { %756 = vst [vmem:[%s1565_s11 + $0x70] sm:$0xff] %v740_v35  ;;  %757 = vst [vmem:[%s1565_s11 + $0x78] sm:$0xff] %v741_v20 }
 0x45d   : > { %754 = vst [vmem:[%s1565_s11 + $0x60] sm:$0xff] %v738_v36  ;;  %755 = vst [vmem:[%s1565_s11 + $0x68] sm:$0xff] %v739_v21 }
 0x45e   : > { %1114 = shalt.err (!%p1111_p2)
}
 0x45f   : > { %s1115_s9 = scalar_lea.hbm %s1596_s29, 2048  ;;  %s1119_s26 = scalar_lea.hbm %s1650_s4, 4096 }
 0x460   : > { %p1116_p4 = scmp.ne.s32.totalorder %s1596_s29, %s1115_s9  ;;  %p1120_p9 = scmp.lt.u32.totalorder %s1596_s29, %s1650_s4 }
 0x461   : > { %p1121_p1 = scmp.lt.u32.totalorder %s1119_s26, %s1115_s9  ;;  %p1123_p6 = scmp.lt.u32.totalorder %s1115_s9, %s1596_s29 }
 0x462   : > { %p1117_p5 = pnand %p1116_p4, %p1657_p11 }
 0x463   : > { %p1122_p3 = por %p1121_p1, %p1120_p9 }
 0x464   : > { %p1118_p7 = pneg %p1117_p5 }
 0x465   : > { %p1124_p12 = por %p1123_p6, %p1122_p3 }
 0x467   : > { %p1125_p13 = pnand %p1124_p12, %p1118_p7 }
 0x469   : > { %1128 = shalt.err (!%p1125_p13)
}
 0x46a   : > { %s1174_s11 = smov 256   ;;  %s1175_s14 = smov 16  }
 0x46b   : > { %1004 = dma.vmem_to_hbm [thread:$0]  (%p1657_p11), %s1598_s12, 2048, %s1596_s29, %s759_s19, %s1174_s11, %s1174_s11, %s1175_s14  }
 0x46c PF: > { %s788_s23 = sand.u32 1, %s1155_s15   ;;  %p1658_p8 = scmp.ne.s32.totalorder %s1655_s28, 0 }
 0x46d   : > { %p1659_p10 = scmp.ge.s32.totalorder %s1167_s18, 2  ;;  %s789_s25 = scalar_lea.sflag [#allocation4], %s788_s23 }
 0x46f   : > { %p1011_p0 = pnand %p1659_p10, %p1658_p8 }
 0x471   : > { %1150 = dma.done.wait (!%p1011_p0), %s789_s25, 2048  }
 0x472   : > { %1152 = vsyncadd (!%p1011_p0), %s789_s25, 4294965248  ;;  %p17_p2 = scmp.ge.s32.totalorder %s1226_s21, 4   ;;  %s1660_s15 = smov %s1159_s16 }
 0x473   : > { %s1661_s16 = smov %s1163_s17  ;;  %s1662_s17 = smov %s1238_s24 }
 0x474   : > { %s1663_s18 = smov %s1226_s21  ;;  %19 = sbr.rel (!%p17_p2) target bundleno = 5 (0x5), region = 81 }
 0x47b   :  { %794 = vsyncpa [#allocation3], 1 }
 0x47c   :  { %796 = vsyncpa [#allocation3 + $0x1], 1 }
 0x47d   :  { %797 = vsyncpa [#allocation4], 1 }
 0x47e   :  { %799 = vsyncpa [#allocation4 + $0x1], 1 }

</bundles_post_ra>
